<compile_context>
chip_gen: v6e
topology: v6e:2x2x1
jax: 0.10.0
libtpu: 0.0.40
codegen_flags: <defaults>
</compile_context>

<pallas_src>
import jax
import jax.numpy as jnp
from jax.experimental import pallas as pl
from jax.experimental.pallas import tpu as pltpu


_TARGET_BLOCK_BYTES = 8 * 1024 * 1024      # ~8 MiB per block buffer
_VMEM_LIMIT_BYTES = 48 * 1024 * 1024       # fits v7x 64 MiB physical VMEM
_MIN_SPLIT_BYTES = 1 * 1024 * 1024         # force >=2 blocks above this (v7x megacore)


def _normalization_kernel(const_ref, img_ref, out_ref):
    # const_ref : VMEM (tr, 2) float32 -- column 0 = mean, column 1 = 1/std
    # img_ref   : VMEM (tr, tl)        -- lane-dense slab of flattened pixels
    # out_ref   : VMEM (tr, tl)
    c = const_ref[...]
    mean = c[:, 0:1]
    inv_std = c[:, 1:2]
    x = img_ref[...].astype(jnp.float32)
    out_ref[...] = ((x - mean) * inv_std).astype(out_ref.dtype)


def _sublane_min(itemsize):
    # Minimum second-to-last tile dim per dtype packing (f32:8, bf16:16, 8-bit:32).
    return {4: 8, 2: 16, 1: 32}.get(itemsize, 8)


def _choose_tiles(n_rows, n_cols, itemsize, target_bytes):
    """Pick (tr, tl) respecting the (sublane,128)-or-full-dim rule with each
    block bounded by `target_bytes`. Partial edge blocks are masked by Pallas."""
    sub = _sublane_min(itemsize)
    total = n_rows * n_cols * itemsize

    if total <= target_bytes:
        return n_rows, n_cols  # whole array is a single block (maybe split later)

    if n_cols % 128 != 0:
        # Full-extent lanes; the wrapper guarantees a minimal-row block fits
        # the budget in this branch (otherwise it lane-pads to 128 first).
        tl = n_cols
    else:
        row_block = min(n_rows, sub)
        tl = (target_bytes // (row_block * itemsize)) // 128 * 128
        tl = max(128, min(tl, n_cols))

    rows_fit = max(1, target_bytes // (tl * itemsize))
    if rows_fit >= n_rows or n_rows <= sub:
        tr = n_rows
    else:
        tr = max(sub, (rows_fit // sub) * sub)
    return tr, tl


def _split_for_megacore(tr, tl, n_rows, n_cols, itemsize, min_split_bytes):
    """If the whole array collapsed to one block but is big enough to matter,
    split it so a 2-TC (v7x) chip can shard the 'parallel' grid axes."""
    total = n_rows * n_cols * itemsize
    if total <= min_split_bytes or tr != n_rows or tl != n_cols:
        return tr, tl
    sub = _sublane_min(itemsize)
    if n_rows >= 2 * sub:
        half = (n_rows + 1) // 2
        tr = ((half + sub - 1) // sub) * sub          # sublane-aligned half
    elif n_cols % 128 == 0 and n_cols >= 256:
        tl = ((n_cols // 128 + 1) // 2) * 128         # 128-aligned half
    return tr, tl


def normalization(img, mean, std, target_block_bytes=_TARGET_BLOCK_BYTES):
    """img: (C, H, W) or (N, C, H, W);  mean, std: (C,) per-channel constants."""
    orig_shape = img.shape
    if img.ndim == 3:
        img4 = img[None]
    elif img.ndim == 4:
        img4 = img
    else:
        raise ValueError("img must be (C, H, W) or (N, C, H, W)")
    if not jnp.issubdtype(img4.dtype, jnp.floating):
        img4 = img4.astype(jnp.float32)   # match PyTorch float32-constant promotion
    N, C, H, W = img4.shape
    dtype = img4.dtype
    itemsize = jnp.dtype(dtype).itemsize

    # Constants always in float32 (exact reciprocal, no bf16/narrow truncation).
    mean_f32 = jnp.asarray(mean, dtype=jnp.float32).reshape(-1)
    std_f32 = jnp.asarray(std, dtype=jnp.float32).reshape(-1)
    if mean_f32.shape[0] != C or std_f32.shape[0] != C:
        raise ValueError("mean/std must have one entry per channel")
    inv_std_f32 = 1.0 / std_f32
    # NOTE: multiply-by-reciprocal differs from true division by <=1-2 ulp.

    # Lane-dense view: rows = (n, c) pairs, lanes = flattened spatial pixels.
    R, L = N * C, H * W
    sub = _sublane_min(itemsize)
    lane_pad = (-L) % 128
    # Pad lanes to 128 only when lane-tiling is unavoidable (a minimal-row,
    # full-lane block would blow the VMEM budget); small non-aligned images
    # skip the extra pad copy and tile rows with full-extent lanes instead.
    needs_pad = lane_pad != 0 and (min(R, sub) * L * itemsize > target_block_bytes)

    img2 = img4.reshape(R, L)
    if needs_pad:
        img2 = jnp.pad(img2, ((0, 0), (0, lane_pad)))
    L_k = img2.shape[1]

    # One merged per-row constant array: (R, 2) = [mean | 1/std].
    consts = jnp.stack(
        [jnp.tile(mean_f32, N), jnp.tile(inv_std_f32, N)], axis=1
    ).astype(jnp.float32)

    tr, tl = _choose_tiles(R, L_k, itemsize, target_block_bytes)
    tr, tl = _split_for_megacore(tr, tl, R, L_k, itemsize, _MIN_SPLIT_BYTES)
    grid = (pl.cdiv(R, tr), pl.cdiv(L_k, tl))

    out2 = pl.pallas_call(
        _normalization_kernel,
        out_shape=jax.ShapeDtypeStruct((R, L_k), dtype),
        grid_spec=pltpu.PrefetchScalarGridSpec(
            num_scalar_prefetch=0,
            grid=grid,
            in_specs=[
                pl.BlockSpec((tr, 2), lambda i, j: (i, 0)),   # merged constants
                pl.BlockSpec((tr, tl), lambda i, j: (i, j)),  # image slab
            ],
            out_specs=pl.BlockSpec((tr, tl), lambda i, j: (i, j)),
        ),
        compiler_params=pltpu.CompilerParams(
            # Pure elementwise: every block is independent -> both axes parallel
            # (lets 2-TC v7x chips shard the HBM-bound work).
            dimension_semantics=("parallel", "parallel"),
            # 2 x (in + out) x 8 MiB = 32 MiB double-buffered + constants; 48 MiB
            # leaves compiler scratch headroom on v7x (64 MiB physical) and
            # exceeds v5e's 16 MiB default scoped limit.
            vmem_limit_bytes=_VMEM_LIMIT_BYTES,
        ),
        cost_estimate=pl.CostEstimate(
            flops=2 * R * L_k,
            transcendentals=0,
            bytes_accessed=2 * R * L_k * itemsize + consts.size * 4,
        ),
    )(consts, img2)

    if needs_pad:
        out2 = out2[:, :L]
    # TODO(synk): expose input_output_aliases={1: 0} for callers that can
    # donate `img`'s HBM buffer (saves the output allocation, not bandwidth).
    return out2.reshape(orig_shape)


if __name__ == "__main__":
    key = jax.random.PRNGKey(0)
    k1, k2, k3 = jax.random.split(key, 3)

    # Standard ImageNet-style normalization constants (deterministic, in-script).
    mean = jnp.array([0.485, 0.456, 0.406], dtype=jnp.float32)
    std = jnp.array([0.229, 0.224, 0.225], dtype=jnp.float32)

    # Case 1: small NCHW input (matches the PyTorch module's (-1,1,1) broadcast).
    N, C, H, W = 2, 3, 16, 16
    img = jax.random.uniform(k1, (N, C, H, W), dtype=jnp.float32)
    out = jax.block_until_ready(normalization(img, mean, std))
    ref = (img - mean.reshape(-1, 1, 1)) / std.reshape(-1, 1, 1)
    assert out.shape == (N, C, H, W)
    assert jnp.allclose(out, ref, atol=1e-6, rtol=1e-5)

    # Case 2: force the multi-block tiled path (tiny block budget) on same data.
    out_tiled = jax.block_until_ready(
        normalization(img, mean, std, target_block_bytes=1024))
    assert jnp.allclose(out_tiled, ref, atol=1e-6, rtol=1e-5)

    # Case 3: 3-D (C,H,W) input with a flattened length not a multiple of 128.
    img3 = jax.random.uniform(k2, (3, 24, 20), dtype=jnp.float32)
    out3 = jax.block_until_ready(normalization(img3, mean, std))
    ref3 = (img3 - mean.reshape(-1, 1, 1)) / std.reshape(-1, 1, 1)
    assert out3.shape == img3.shape
    assert jnp.allclose(out3, ref3, atol=1e-6, rtol=1e-5)

    # Case 4: >1 MiB input exercises the megacore block split (grid != (1,1)).
    img4 = jax.random.uniform(k3, (2, 3, 256, 256), dtype=jnp.float32)
    out4 = jax.block_until_ready(normalization(img4, mean, std))
    ref4 = (img4 - mean.reshape(-1, 1, 1)) / std.reshape(-1, 1, 1)
    assert out4.shape == img4.shape
    assert jnp.allclose(out4, ref4, atol=1e-6, rtol=1e-5)

    print("KERNEL_OK")
</pallas_src>

<mosaic_0001>
module attributes {stable_mosaic.version = 11 : i64} {
  func.func @_normalization_kernel(%arg0: i32, %arg1: i32, %arg2: memref<6x2xf32, #tpu.memory_space<vmem>>, %arg3: memref<6x256xf32, #tpu.memory_space<vmem>>, %arg4: memref<6x256xf32, #tpu.memory_space<vmem>>) attributes {dimension_semantics = [#tpu.dimension_semantics<parallel>, #tpu.dimension_semantics<parallel>], iteration_bounds = array<i64: 1, 1>, scalar_prefetch = 0 : i64, scratch_operands = 0 : i64, tpu.core_type = #tpu.core_type<tc>, window_params = [{transform_indices = @transform_0, window_bounds = array<i64: 6, 2>}, {transform_indices = @transform_1, window_bounds = array<i64: 6, 256>}, {transform_indices = @transform_2, window_bounds = array<i64: 6, 256>}]} {
    %c0 = arith.constant 0 : index
    %c0_0 = arith.constant 0 : index
    %0 = vector.load %arg2[%c0, %c0_0] : memref<6x2xf32, #tpu.memory_space<vmem>>, vector<6x2xf32>
    %1 = vector.extract_strided_slice %0 {offsets = [0, 0], sizes = [6, 1], strides = [1, 1]} : vector<6x2xf32> to vector<6x1xf32>
    %2 = vector.extract_strided_slice %0 {offsets = [0, 1], sizes = [6, 1], strides = [1, 1]} : vector<6x2xf32> to vector<6x1xf32>
    %c0_1 = arith.constant 0 : index
    %c0_2 = arith.constant 0 : index
    %3 = vector.load %arg3[%c0_1, %c0_2] : memref<6x256xf32, #tpu.memory_space<vmem>>, vector<6x256xf32>
    %4 = vector.broadcast %1 : vector<6x1xf32> to vector<6x256xf32>
    %5 = arith.subf %3, %4 : vector<6x256xf32>
    %6 = vector.broadcast %2 : vector<6x1xf32> to vector<6x256xf32>
    %7 = arith.mulf %5, %6 : vector<6x256xf32>
    %c0_3 = arith.constant 0 : index
    %c0_4 = arith.constant 0 : index
    %8 = vector.load %arg4[%c0_3, %c0_4] : memref<6x256xf32, #tpu.memory_space<vmem>>, vector<6x256xf32>
    tpu.vector_store %arg4[%c0_3, %c0_4], %7 {strides = array<i32>} : memref<6x256xf32, #tpu.memory_space<vmem>>, vector<6x256xf32>,
    return
  }
  func.func @transform_0(%arg0: i32, %arg1: i32) -> (i32, i32) {
    %c0_i32 = arith.constant 0 : i32
    %c0_i32_0 = arith.constant 0 : i32
    return %arg0, %c0_i32 : i32, i32
  }
  func.func @transform_1(%arg0: i32, %arg1: i32) -> (i32, i32) {
    %c0_i32 = arith.constant 0 : i32
    return %arg0, %arg1 : i32, i32
  }
  func.func @transform_2(%arg0: i32, %arg1: i32) -> (i32, i32) {
    %c0_i32 = arith.constant 0 : i32
    return %arg0, %arg1 : i32, i32
  }
}

</mosaic_0001>

<bundles_post_ra>
// kernel: tpu_custom_call.1
= control target key start
LH: loop header
LB: loop body
LE: loop exit
PB: predicated region body
PF: predicated region fallthrough
CT: control target
= control target key end

     0   :  { %7 = vsyncpa [#allocation3], 0  ;;  %s135_s0 = inlined_call_operand.vmem [shape: f32[6,2], index: 0, kind: input, shape index: {}]   ;;  %s136_s1 = inlined_call_operand.hbm [shape: f32[6,256], index: 1, kind: input, shape index: {}]   ;;  %s137_s2 = inlined_call_operand.hbm [shape: f32[6,256], index: 2, kind: output, shape index: {}]  }
   0x1   :  { %8 = vsyncpa [#allocation4], 0  ;;  %s107_s9 = smov [#allocation2]  }
   0x2   :  { %s17_s10 = sshll.u32 %s107_s9, 4  ;;  %s18_s10 = int_to_ptr.vmem [resolvable:$true] %s17_s10 }
   0x3   :  { %s71_s11 = scalar_lea.vmem %s18_s10, 256  ;;  %p76_p1 = scmp.lt.s32.totalorder %s18_s10, %s18_s10 }
   0x4   :  { %p72_p0 = scmp.ne.s32.totalorder %s18_s10, %s71_s11  ;;  %p77_p2 = scmp.lt.s32.totalorder %s71_s11, %s71_s11 }
   0x6   :  { %p78_p3 = por %p77_p2, %p76_p1 }
   0x8   :  { %p79_p4 = pnand %p78_p3, %p72_p0 }
   0xa   :  { %82 = shalt.err (!%p79_p4)
}
   0xb   :  { %20 = dma.hbm_to_vmem [thread:$0]  %s136_s1, 256, %s18_s10, [#allocation3]  }
   0xc   :  { %103 = dma.done.wait [#allocation3], 256  }
   0xd   :  { %104 = vsyncadd [#allocation3], 4294967040  ;;  %v108_v0 = vmov 0   ;;  %v24_v1 = vld [vmem:[%s135_s0] sm:$0x3f]  ;;  %v109_v2 = vmov 1  }
   0xe   :  { %61 = vset.pattern.permute.xlu0 %v108_v0  ;;  %v25_v4 = vld [vmem:[#allocation2] sm:$0x3f]  ;;  %v26_v5 = vld [vmem:[#allocation2 + $0x8] sm:$0x3f]  ;;  %s110_s16 = smov [#allocation5]  }
   0xf   :  { %29 = vperm.xlu0 %61, %v24_v1   ;;  %s48_s17 = sshll.u32 %s110_s16, 4  ;;  %s49_s17 = int_to_ptr.vmem [resolvable:$true] %s48_s17 }
  0x10   :  { %s83_s1 = scalar_lea.vmem %s49_s17, 256  ;;  %p88_p6 = scmp.lt.s32.totalorder %s49_s17, %s49_s17 }
  0x11   :  { %p84_p5 = scmp.ne.s32.totalorder %s49_s17, %s83_s1  ;;  %p89_p7 = scmp.lt.s32.totalorder %s83_s1, %s83_s1 }
  0x13   :  { %62 = vset.pattern.permute.xlu0 %v109_v2  ;;  %p90_p8 = por %p89_p7, %p88_p6 }
  0x14   :  { %35 = vperm.xlu0 %62, %v24_v1  }
  0x15   :  { %p91_p9 = pnand %p90_p8, %p84_p5 }
  0x8a   :  { %v30_v3 = vpop.permute.xlu0 %29 }
  0x8b   :  { %v32_v6 = vsub.f32 %v25_v4, %v30_v3  ;;  %v33_v7 = vsub.f32 %v26_v5, %v30_v3 }
  0x8f   :  { %v36_v8 = vpop.permute.xlu0 %35 }
  0x90   :  { %v38_v9 = vmul.f32 %v36_v8, %v32_v6  ;;  %v39_v10 = vmul.f32 %v36_v8, %v33_v7 }
  0x92   :  { %40 = vst [vmem:[#allocation5] sm:$0x3f] %v38_v9  ;;  %41 = vst [vmem:[#allocation5 + $0x8] sm:$0x3f] %v39_v10 }
  0x93   :  { %94 = shalt.err (!%p91_p9)
}
  0x94   :  { %51 = dma.vmem_to_hbm [thread:$0]  %s49_s17, 256, %s137_s2, [#allocation4]  }
  0x95   :  { %105 = dma.done.wait [#allocation4], 256  }
  0x96   :  { %106 = vsyncadd [#allocation4], 4294967040 }
  0x97   :  { %55 = vsyncpa [#allocation3], 1 }
  0x98   :  { %56 = vsyncpa [#allocation4], 1 }

</bundles_post_ra>
